<compile_context>
chip_gen: v7x
topology: tpu7x:2x2x1
jax: 0.10.0
libtpu: 0.0.40
codegen_flags: <defaults>
</compile_context>

<pallas_src>
import jax
import jax.numpy as jnp
from jax.experimental import pallas as pl
from jax.experimental.pallas import tpu as pltpu

HIDDEN = 256


def _round_up(x, m):
    return ((x + m - 1) // m) * m


def _cdiv(a, b):
    return -(-a // b)


def _tpu_generation():
    """Best-effort TPU generation from device_kind; 0 if unknown (safe defaults)."""
    try:
        kind = jax.devices()[0].device_kind.lower()
    except Exception:
        return 0
    if "v7" in kind or "7x" in kind:
        return 7
    if "v6" in kind or "trillium" in kind:
        return 6
    if "v5" in kind:
        return 5
    if "v4" in kind:
        return 4
    if "v3" in kind:
        return 3
    if "v2" in kind:
        return 2
    return 0


def _elementwise_dtype():
    # v6e / v7x have native bf16 VPU ALUs; v5e and older do not.
    return jnp.bfloat16 if _tpu_generation() >= 6 else jnp.float32


def _num_tensorcores():
    # v7x exposes 2 TensorCores per chip behind one device.
    return 2 if _tpu_generation() >= 7 else 1


def _make_critic_kernel(ew_dtype):
    def kernel(sa_ref, w14_ref, b14_ref, w25_ref, b25_ref, w36t_ref, b36t_ref, q_ref):
        bf16 = jnp.bfloat16
        sa = sa_ref[...].astype(bf16)

        # Layer 1 (both heads fused along N): [TB, in_dim] @ [in_dim, 512].
        h = jnp.dot(sa, w14_ref[...], preferred_element_type=jnp.float32)
        h = jnp.maximum(h.astype(ew_dtype) + b14_ref[...], 0.0).astype(bf16)

        # Layer 2 (block-diagonal fusion of both heads): [TB, 512] @ [512, 512].
        h = jnp.dot(h, w25_ref[...], preferred_element_type=jnp.float32)
        h = jnp.maximum(h.astype(ew_dtype) + b25_ref[...], 0.0).astype(bf16)

        # Layer 3: [2, 512] x [TB, 512]^T -> lane-dense [2, TB] (A @ B^T pattern).
        qt = jax.lax.dot_general(
            w36t_ref[...], h, (((1,), (1,)), ((), ())),
            preferred_element_type=jnp.float32)
        q_ref[0] = (qt + b36t_ref[...]).astype(q_ref.dtype)

    return kernel


def prepare_critic_params(params):
    """One-time param prep: head fusion (layers 1/2/3) + bf16 weight cast."""
    bf16, f32 = jnp.bfloat16, jnp.float32
    H = HIDDEN
    z = jnp.zeros((H, H), f32)

    w14 = jnp.concatenate([params["w1"], params["w4"]], axis=1)          # [in, 2H]
    b14 = jnp.concatenate([params["b1"], params["b4"]], axis=1)          # [1, 2H]
    w25 = jnp.block([[params["w2"], z], [z, params["w5"]]])              # [2H, 2H]
    b25 = jnp.concatenate([params["b2"], params["b5"]], axis=1)          # [1, 2H]
    zr = jnp.zeros((1, H), f32)
    w36t = jnp.concatenate(
        [jnp.concatenate([params["w3"].T, zr], axis=1),
         jnp.concatenate([zr, params["w6"].T], axis=1)], axis=0)         # [2, 2H]
    b36t = jnp.concatenate([params["b3"], params["b6"]], axis=0)         # [2, 1]

    return {
        "w14": w14.astype(bf16),
        "b14": b14.astype(f32),
        "w25": w25.astype(bf16),
        "b25": b25.astype(f32),
        "w36t": w36t.astype(bf16),
        "b36t": b36t.astype(f32),
    }


def critic_forward(state, action, prepared):
    """Pallas implementation of Critic.forward(state, action) -> (q1, q2)."""
    B = state.shape[0]
    sa = jnp.concatenate([state, action], axis=1).astype(jnp.float32)
    in_dim = sa.shape[1]
    H2 = 2 * HIDDEN

    ew_dtype = _elementwise_dtype()
    n_tc = _num_tensorcores()

    # --- batch tiling: padding < one tile; >=2 parallel tiles on dual-TC chips ---
    TB_MAX = 1024
    num_tiles = max(1, _cdiv(B, TB_MAX))
    if n_tc > 1 and num_tiles < n_tc and B >= n_tc * 8:
        num_tiles = n_tc
    TB = _round_up(_cdiv(B, num_tiles), 8)
    num_tiles = _cdiv(B, TB)
    B_pad = num_tiles * TB
    if B_pad != B:
        sa = jnp.pad(sa, ((0, B_pad - B), (0, 0)))

    operands = (
        sa,
        prepared["w14"], prepared["b14"].astype(ew_dtype),
        prepared["w25"], prepared["b25"].astype(ew_dtype),
        prepared["w36t"], prepared["b36t"],
    )

    in_specs = [pl.BlockSpec((TB, in_dim), lambda i: (i, 0))] + [
        pl.BlockSpec(op.shape, lambda i: (0, 0)) for op in operands[1:]
    ]

    flops = 2 * B_pad * (in_dim * H2 + H2 * H2 + H2 * 2)
    weight_bytes = sum(int(op.size) * op.dtype.itemsize for op in operands[1:])
    bytes_accessed = (weight_bytes
                      + int(sa.size) * sa.dtype.itemsize
                      + B_pad * 2 * 4)
    cost = pl.CostEstimate(flops=flops, transcendentals=0,
                           bytes_accessed=bytes_accessed)

    q = pl.pallas_call(
        _make_critic_kernel(ew_dtype),
        out_shape=jax.ShapeDtypeStruct((num_tiles, 2, TB), jnp.float32),
        grid=(num_tiles,),
        in_specs=in_specs,
        out_specs=pl.BlockSpec((1, 2, TB), lambda i: (i, 0, 0)),
        compiler_params=pltpu.CompilerParams(
            dimension_semantics=("parallel",),
            vmem_limit_bytes=32 * 1024 * 1024),
        cost_estimate=cost,
    )(*operands)

    # (num_tiles, 2, TB) -> per-head [B, 1] (row slices; batch order preserved).
    q1 = q[:, 0, :].reshape(B_pad, 1)[:B]
    q2 = q[:, 1, :].reshape(B_pad, 1)[:B]
    return q1, q2


def init_critic_params(key, state_dim, action_dim):
    """Deterministic init mirroring nn.Linear defaults (U[-1/sqrt(fan_in), +])."""
    in_dim = state_dim + action_dim
    dims = [(in_dim, HIDDEN), (HIDDEN, HIDDEN), (HIDDEN, 1),
            (in_dim, HIDDEN), (HIDDEN, HIDDEN), (HIDDEN, 1)]
    params = {}
    keys = jax.random.split(key, 2 * len(dims))
    for i, (fan_in, fan_out) in enumerate(dims):
        bound = 1.0 / (float(fan_in) ** 0.5)
        # stored as [in, out] (transposed vs torch's [out, in])
        params[f"w{i+1}"] = jax.random.uniform(
            keys[2 * i], (fan_in, fan_out), jnp.float32, -bound, bound)
        params[f"b{i+1}"] = jax.random.uniform(
            keys[2 * i + 1], (1, fan_out), jnp.float32, -bound, bound)
    return params


def _critic_forward_ref_f32(state, action, params):
    """Full-f32 reference matching the original torch module."""
    sa = jnp.concatenate([state, action], axis=1)
    h1 = jnp.maximum(sa @ params["w1"] + params["b1"], 0.0)
    h1 = jnp.maximum(h1 @ params["w2"] + params["b2"], 0.0)
    q1 = h1 @ params["w3"] + params["b3"]
    h2 = jnp.maximum(sa @ params["w4"] + params["b4"], 0.0)
    h2 = jnp.maximum(h2 @ params["w5"] + params["b5"], 0.0)
    q2 = h2 @ params["w6"] + params["b6"]
    return q1, q2


def _critic_forward_ref_kernelmath(state, action, p, ew_dtype):
    """Plain-JAX mirror of the kernel math (bf16 weights, f32 MXU accumulation)."""
    bf16, f32 = jnp.bfloat16, jnp.float32
    sa = jnp.concatenate([state, action], axis=1).astype(bf16)
    h = jnp.dot(sa, p["w14"], preferred_element_type=f32)
    h = jnp.maximum(h.astype(ew_dtype) + p["b14"].astype(ew_dtype), 0.0).astype(bf16)
    h = jnp.dot(h, p["w25"], preferred_element_type=f32)
    h = jnp.maximum(h.astype(ew_dtype) + p["b25"].astype(ew_dtype), 0.0).astype(bf16)
    qt = jax.lax.dot_general(p["w36t"], h, (((1,), (1,)), ((), ())),
                             preferred_element_type=f32) + p["b36t"]
    return qt[0][:, None], qt[1][:, None]


if __name__ == "__main__":
    key = jax.random.PRNGKey(0)
    k_param, k_state, k_action = jax.random.split(key, 3)

    B, STATE_DIM, ACTION_DIM = 8, 16, 16
    params = init_critic_params(k_param, STATE_DIM, ACTION_DIM)
    prepared = prepare_critic_params(params)
    ew_dtype = _elementwise_dtype()

    state = jax.random.normal(k_state, (B, STATE_DIM), jnp.float32)
    action = jax.random.normal(k_action, (B, ACTION_DIM), jnp.float32)

    fwd = jax.jit(critic_forward)
    q1, q2 = fwd(state, action, prepared)
    jax.block_until_ready((q1, q2))
    assert q1.shape == (B, 1) and q2.shape == (B, 1)

    # Tight check against a plain-JAX mirror of the kernel math (same fused params).
    q1_ref, q2_ref = _critic_forward_ref_kernelmath(state, action, prepared, ew_dtype)
    assert jnp.allclose(q1, q1_ref, atol=2e-3, rtol=2e-3)
    assert jnp.allclose(q2, q2_ref, atol=2e-3, rtol=2e-3)

    # Loose sanity check against the full-f32 torch-equivalent forward
    # (bf16 weights/activations are a deliberate perf tradeoff).
    q1_f32, q2_f32 = _critic_forward_ref_f32(state, action, params)
    assert jnp.allclose(q1, q1_f32, atol=5e-2, rtol=5e-2)
    assert jnp.allclose(q2, q2_f32, atol=5e-2, rtol=5e-2)

    # Exercise the padded / non-multiple-of-8 batch path as well.
    Bo = 13
    state_o = jax.random.normal(jax.random.PRNGKey(3), (Bo, STATE_DIM), jnp.float32)
    action_o = jax.random.normal(jax.random.PRNGKey(4), (Bo, ACTION_DIM), jnp.float32)
    q1o, q2o = jax.jit(critic_forward)(state_o, action_o, prepared)
    jax.block_until_ready((q1o, q2o))
    q1o_ref, q2o_ref = _critic_forward_ref_kernelmath(state_o, action_o, prepared, ew_dtype)
    assert q1o.shape == (Bo, 1) and q2o.shape == (Bo, 1)
    assert jnp.allclose(q1o, q1o_ref, atol=2e-3, rtol=2e-3)
    assert jnp.allclose(q2o, q2o_ref, atol=2e-3, rtol=2e-3)

    print("KERNEL_OK")
</pallas_src>

<mosaic_0001>
module attributes {stable_mosaic.version = 11 : i64} {
  func.func @kernel(%arg0: i32, %arg1: memref<8x32xf32, #tpu.memory_space<vmem>>, %arg2: memref<32x512xbf16, #tpu.memory_space<vmem>>, %arg3: memref<1x512xf32, #tpu.memory_space<vmem>>, %arg4: memref<512x512xbf16, #tpu.memory_space<vmem>>, %arg5: memref<1x512xf32, #tpu.memory_space<vmem>>, %arg6: memref<2x512xbf16, #tpu.memory_space<vmem>>, %arg7: memref<2x1xf32, #tpu.memory_space<vmem>>, %arg8: memref<1x2x8xf32, #tpu.memory_space<vmem>>) attributes {dimension_semantics = [#tpu.dimension_semantics<parallel>], iteration_bounds = array<i64: 1>, scalar_prefetch = 0 : i64, scratch_operands = 0 : i64, tpu.core_type = #tpu.core_type<tc>, window_params = [{transform_indices = @transform_0, window_bounds = array<i64: 8, 32>}, {pipeline_mode = #tpu.pipeline_mode<synchronous>, transform_indices = @transform_1, window_bounds = array<i64: 32, 512>}, {pipeline_mode = #tpu.pipeline_mode<synchronous>, transform_indices = @transform_2, window_bounds = array<i64: 1, 512>}, {pipeline_mode = #tpu.pipeline_mode<synchronous>, transform_indices = @transform_3, window_bounds = array<i64: 512, 512>}, {pipeline_mode = #tpu.pipeline_mode<synchronous>, transform_indices = @transform_4, window_bounds = array<i64: 1, 512>}, {pipeline_mode = #tpu.pipeline_mode<synchronous>, transform_indices = @transform_5, window_bounds = array<i64: 2, 512>}, {pipeline_mode = #tpu.pipeline_mode<synchronous>, transform_indices = @transform_6, window_bounds = array<i64: 2, 1>}, {transform_indices = @transform_7, window_bounds = array<i64: 1, 2, 8>}]} {
    %c0 = arith.constant 0 : index
    %c0_0 = arith.constant 0 : index
    %0 = vector.load %arg1[%c0, %c0_0] : memref<8x32xf32, #tpu.memory_space<vmem>>, vector<8x32xf32>
    %1 = arith.truncf %0 : vector<8x32xf32> to vector<8x32xbf16>
    %c0_1 = arith.constant 0 : index
    %c0_2 = arith.constant 0 : index
    %2 = vector.load %arg2[%c0_1, %c0_2] : memref<32x512xbf16, #tpu.memory_space<vmem>>, vector<32x512xbf16>
    %cst = arith.constant dense<0.000000e+00> : vector<8x512xf32>
    %3 = tpu.matmul %1, %2, %cst {dimension_numbers = #tpu.dot_dimension_numbers<[1], [0], [0], [1], [0, 0, 1, 1], [], []>} : vector<8x32xbf16>, vector<32x512xbf16>, vector<8x512xf32> -> vector<8x512xf32>
    %c0_3 = arith.constant 0 : index
    %c0_4 = arith.constant 0 : index
    %4 = vector.load %arg3[%c0_3, %c0_4] : memref<1x512xf32, #tpu.memory_space<vmem>>, vector<1x512xf32>
    %5 = vector.broadcast %4 : vector<1x512xf32> to vector<8x512xf32>
    %6 = arith.addf %3, %5 : vector<8x512xf32>
    %cst_5 = arith.constant 0.000000e+00 : f32
    %7 = vector.broadcast %cst_5 : f32 to vector<8x512xf32>
    %8 = arith.maximumf %6, %7 : vector<8x512xf32>
    %9 = arith.truncf %8 : vector<8x512xf32> to vector<8x512xbf16>
    %c0_6 = arith.constant 0 : index
    %c0_7 = arith.constant 0 : index
    %10 = vector.load %arg4[%c0_6, %c0_7] : memref<512x512xbf16, #tpu.memory_space<vmem>>, vector<512x512xbf16>
    %cst_8 = arith.constant dense<0.000000e+00> : vector<8x512xf32>
    %11 = tpu.matmul %9, %10, %cst_8 {dimension_numbers = #tpu.dot_dimension_numbers<[1], [0], [0], [1], [0, 0, 1, 1], [], []>} : vector<8x512xbf16>, vector<512x512xbf16>, vector<8x512xf32> -> vector<8x512xf32>
    %c0_9 = arith.constant 0 : index
    %c0_10 = arith.constant 0 : index
    %12 = vector.load %arg5[%c0_9, %c0_10] : memref<1x512xf32, #tpu.memory_space<vmem>>, vector<1x512xf32>
    %13 = vector.broadcast %12 : vector<1x512xf32> to vector<8x512xf32>
    %14 = arith.addf %11, %13 : vector<8x512xf32>
    %cst_11 = arith.constant 0.000000e+00 : f32
    %15 = vector.broadcast %cst_11 : f32 to vector<8x512xf32>
    %16 = arith.maximumf %14, %15 : vector<8x512xf32>
    %17 = arith.truncf %16 : vector<8x512xf32> to vector<8x512xbf16>
    %c0_12 = arith.constant 0 : index
    %c0_13 = arith.constant 0 : index
    %18 = vector.load %arg6[%c0_12, %c0_13] : memref<2x512xbf16, #tpu.memory_space<vmem>>, vector<2x512xbf16>
    %cst_14 = arith.constant dense<0.000000e+00> : vector<2x8xf32>
    %19 = tpu.matmul %18, %17, %cst_14 {dimension_numbers = #tpu.dot_dimension_numbers<[1], [1], [0], [0], [0, 0, 1, 0], [], []>} : vector<2x512xbf16>, vector<8x512xbf16>, vector<2x8xf32> -> vector<2x8xf32>
    %c0_15 = arith.constant 0 : index
    %c0_16 = arith.constant 0 : index
    %20 = vector.load %arg7[%c0_15, %c0_16] : memref<2x1xf32, #tpu.memory_space<vmem>>, vector<2x1xf32>
    %21 = vector.broadcast %20 : vector<2x1xf32> to vector<2x8xf32>
    %22 = arith.addf %19, %21 : vector<2x8xf32>
    %c0_17 = arith.constant 0 : index
    %c0_18 = arith.constant 0 : index
    %c0_19 = arith.constant 0 : index
    %23 = vector.load %arg8[%c0_17, %c0_18, %c0_19] : memref<1x2x8xf32, #tpu.memory_space<vmem>>, vector<1x2x8xf32>
    %24 = vector.shape_cast %23 : vector<1x2x8xf32> to vector<2x8xf32>
    %25 = vector.shape_cast %22 : vector<2x8xf32> to vector<1x2x8xf32>
    tpu.vector_store %arg8[%c0_17, %c0_18, %c0_19], %25 {strides = array<i32>} : memref<1x2x8xf32, #tpu.memory_space<vmem>>, vector<1x2x8xf32>,
    return
  }
  func.func @transform_0(%arg0: i32) -> (i32, i32) {
    %c0_i32 = arith.constant 0 : i32
    %c0_i32_0 = arith.constant 0 : i32
    return %arg0, %c0_i32 : i32, i32
  }
  func.func @transform_1(%arg0: i32) -> (i32, i32) {
    %c0_i32 = arith.constant 0 : i32
    %c0_i32_0 = arith.constant 0 : i32
    %c0_i32_1 = arith.constant 0 : i32
    return %c0_i32, %c0_i32_0 : i32, i32
  }
  func.func @transform_2(%arg0: i32) -> (i32, i32) {
    %c0_i32 = arith.constant 0 : i32
    %c0_i32_0 = arith.constant 0 : i32
    %c0_i32_1 = arith.constant 0 : i32
    return %c0_i32, %c0_i32_0 : i32, i32
  }
  func.func @transform_3(%arg0: i32) -> (i32, i32) {
    %c0_i32 = arith.constant 0 : i32
    %c0_i32_0 = arith.constant 0 : i32
    %c0_i32_1 = arith.constant 0 : i32
    return %c0_i32, %c0_i32_0 : i32, i32
  }
  func.func @transform_4(%arg0: i32) -> (i32, i32) {
    %c0_i32 = arith.constant 0 : i32
    %c0_i32_0 = arith.constant 0 : i32
    %c0_i32_1 = arith.constant 0 : i32
    return %c0_i32, %c0_i32_0 : i32, i32
  }
  func.func @transform_5(%arg0: i32) -> (i32, i32) {
    %c0_i32 = arith.constant 0 : i32
    %c0_i32_0 = arith.constant 0 : i32
    %c0_i32_1 = arith.constant 0 : i32
    return %c0_i32, %c0_i32_0 : i32, i32
  }
  func.func @transform_6(%arg0: i32) -> (i32, i32) {
    %c0_i32 = arith.constant 0 : i32
    %c0_i32_0 = arith.constant 0 : i32
    %c0_i32_1 = arith.constant 0 : i32
    return %c0_i32, %c0_i32_0 : i32, i32
  }
  func.func @transform_7(%arg0: i32) -> (i32, i32, i32) {
    %c0_i32 = arith.constant 0 : i32
    %c0_i32_0 = arith.constant 0 : i32
    %c0_i32_1 = arith.constant 0 : i32
    return %arg0, %c0_i32, %c0_i32_0 : i32, i32, i32
  }
}

</mosaic_0001>

<bundles_post_ra>
// kernel: critic_forward.1
= control target key start
LH: loop header
LB: loop body
LE: loop exit
PB: predicated region body
PF: predicated region fallthrough
CT: control target
= control target key end

     0   :  { %12 = vsyncpa [#allocation3], 0  ;;  %s1840_s0 = inlined_call_operand.vmem [shape: f32[8,32], index: 0, kind: input, shape index: {}]   ;;  %s1841_s1 = inlined_call_operand.hbm [shape: bf16[32,512], index: 1, kind: input, shape index: {}]   ;;  %s1842_s2 = inlined_call_operand.vmem [shape: f32[1,512], index: 2, kind: input, shape index: {}]   ;;  %s1843_s3 = inlined_call_operand.hbm [shape: bf16[512,512], index: 3, kind: input, shape index: {}]   ;;  %s1844_s4 = inlined_call_operand.vmem [shape: f32[1,512], index: 4, kind: input, shape index: {}]   ;;  %s1845_s5 = inlined_call_operand.vmem [shape: bf16[2,512], index: 5, kind: input, shape index: {}]   ;;  %s1846_s6 = inlined_call_operand.vmem [shape: f32[2,1], index: 6, kind: input, shape index: {}]   ;;  %s1847_s7 = inlined_call_operand.vmem [shape: f32[1,2,8], index: 7, kind: output, shape index: {}]  }
   0x1   :  { %13 = vsyncpa [#allocation5], 0  ;;  %s1722_s24 = smov [#allocation2]   ;;  %s1674_s28 = scalar_lea.hbm %s1841_s1, 1024 }
   0x2   :  { %s21_s25 = sshll.u32 %s1722_s24, 4  ;;  %p1675_p0 = scmp.ne.s32.totalorder %s1841_s1, %s1674_s28  ;;  %s22_s25 = int_to_ptr.vmem [resolvable:$true] %s21_s25 }
   0x3   :  { %p1678_p1 = scmp.lt.u32.totalorder %s1674_s28, %s1841_s1 }
   0x5   :  { %p1680_p2 = pnand %p1678_p1, %p1675_p0 }
   0x7   :  { %1683 = shalt.err (!%p1680_p2)
}
   0x8   :  { %s1684_s10 = scalar_lea.vmem %s22_s25, 1024  ;;  %p1689_p4 = scmp.lt.s32.totalorder %s22_s25, %s22_s25 }
   0x9   :  { %p1685_p3 = scmp.ne.s32.totalorder %s22_s25, %s1684_s10  ;;  %p1690_p5 = scmp.lt.s32.totalorder %s1684_s10, %s1684_s10 }
   0xb   :  { %p1691_p6 = por %p1690_p5, %p1689_p4 }
   0xd   :  { %p1692_p7 = pnand %p1691_p6, %p1685_p3 }
   0xf   :  { %1695 = shalt.err (!%p1692_p7)
}
  0x10   :  { %s1723_s11 = smov 256   ;;  %s1724_s12 = smov 16  }
  0x11   :  { %27 = dma.hbm_to_vmem [thread:$0]  %s1841_s1, 1024, %s22_s25, [#allocation3], %s1723_s11, %s1723_s11, %s1724_s12  }
  0x12   :  { %s1725_s15 = smov [#allocation4]   ;;  %s1696_s19 = scalar_lea.hbm %s1843_s3, 16384 }
  0x13   :  { %s35_s16 = sshll.u32 %s1725_s15, 4  ;;  %p1697_p8 = scmp.ne.s32.totalorder %s1843_s3, %s1696_s19  ;;  %s36_s16 = int_to_ptr.vmem [resolvable:$true] %s35_s16 }
  0x14   :  { %p1700_p9 = scmp.lt.u32.totalorder %s1696_s19, %s1843_s3 }
  0x16   :  { %p1702_p10 = pnand %p1700_p9, %p1697_p8 }
  0x18   :  { %1705 = shalt.err (!%p1702_p10)
}
  0x19   :  { %s1706_s24 = scalar_lea.vmem %s36_s16, 16384  ;;  %p1711_p12 = scmp.lt.s32.totalorder %s36_s16, %s36_s16 }
  0x1a   :  { %p1707_p11 = scmp.ne.s32.totalorder %s36_s16, %s1706_s24  ;;  %p1712_p13 = scmp.lt.s32.totalorder %s1706_s24, %s1706_s24 }
  0x1c   :  { %p1713_p0 = por %p1712_p13, %p1711_p12 }
  0x1e   :  { %p1714_p1 = pnand %p1713_p0, %p1707_p11 }
  0x20   :  { %1717 = shalt.err (!%p1714_p1)
}
  0x21   :  { %41 = dma.hbm_to_vmem [thread:$0]  %s1843_s3, 16384, %s36_s16, [#allocation5], %s1723_s11, %s1723_s11, %s1724_s12  }
  0x22   :  { %1718 = dma.done.wait [#allocation3], 1024  }
  0x23   :  { %1719 = vsyncadd [#allocation3], 4294966272 }
  0x24   :  { %1720 = dma.done.wait [#allocation5], 16384  }
  0x25   :  { %1721 = vsyncadd [#allocation5], 4294950912  ;;  %v1726_v0 = vmov 0   ;;  %v1470_v1 = vld [vmem:[#allocation2 + $0x4] ss:$16 sps:$4 sm:$0xff]   ;;  %vm127_vm0 = vcmask 261120  }
  0x26   :  { %163 = vmatprep.mubr.bf16.mxu1 %v1726_v0  ;;  %1469 = vset.pattern.permute.xlu0 %v1726_v0  ;;  %v1472_v2 = vld [vmem:[#allocation2] ss:$16 sps:$4 sm:$0xff]   ;;  %v1473_v3 = vld [vmem:[#allocation2 + $0x24] ss:$16 sps:$4 sm:$0xff]   ;;  %v1478_v6 = vld [vmem:[#allocation2 + $0xc] ss:$16 sps:$4 sm:$0xff]  }
  0x27   :  { %131 = vmatprep.subr.bf16.mxu1 %v1470_v1  ;;  %v1475_v4 = vld [vmem:[#allocation2 + $0x20] ss:$16 sps:$4 sm:$0xff]   ;;  %v1482_v8 = vld [vmem:[#allocation4 + $0x4] ss:$16 sps:$4 sm:$0xff]   ;;  %v1476_v9 = vld [vmem:[#allocation2 + $0x8] ss:$16 sps:$4 sm:$0xff]  }
  0x28   :  { %132 = vmatpush1.bf16.msra.mxu1 %v1472_v2  ;;  %v55_v5 = vld [vmem:[%s1840_s0] sm:$0xff]  ;;  %v1481_v10 = vld [vmem:[#allocation2 + $0x2c] ss:$16 sps:$4 sm:$0xff]   ;;  %1011 = vmatprep.subr.bf16.mxu0 %v1482_v8  ;;  %v1479_v13 = vld [vmem:[#allocation2 + $0x28] ss:$16 sps:$4 sm:$0xff]   ;;  %vm1299_vm1 = vcmask 58368  }
  0x29   :  { %133 = vmatprep.subr.bf16.mxu1 %v1473_v3  ;;  %v56_v7 = vpack.c.bf16 %v55_v5, %v55_v5  ;;  %v1487_v11 = vld [vmem:[#allocation4] ss:$16 sps:$4 sm:$0xff]   ;;  %v1488_v12 = vld [vmem:[#allocation4 + $0x24] ss:$16 sps:$4 sm:$0xff]   ;;  %v1486_v16 = vld [vmem:[#allocation4 + $0xc] ss:$16 sps:$4 sm:$0xff]  }
  0x2a   :  { %1012 = vmatpush1.bf16.msra.mxu0 %v1487_v11  ;;  %v1493_v14 = vld [vmem:[#allocation4 + $0x20] ss:$16 sps:$4 sm:$0xff]   ;;  %v1494_v15 = vld [vmem:[#allocation4 + $0x44] ss:$16 sps:$4 sm:$0xff]   ;;  %v1484_v18 = vld [vmem:[#allocation4 + $0x8] ss:$16 sps:$4 sm:$0xff]  }
  0x2b   :  { %1013 = vmatprep.subr.bf16.mxu0 %v1488_v12  ;;  %v1499_v17 = vld [vmem:[#allocation4 + $0x40] ss:$16 sps:$4 sm:$0xff]   ;;  %v1500_v19 = vld [vmem:[#allocation4 + $0x64] ss:$16 sps:$4 sm:$0xff]   ;;  %v1492_v20 = vld [vmem:[#allocation4 + $0x2c] ss:$16 sps:$4 sm:$0xff]  }
  0x2c   :  { %134 = vmatpush1.bf16.msra.mxu1 %v1475_v4  ;;  %v1490_v21 = vld [vmem:[#allocation4 + $0x28] ss:$16 sps:$4 sm:$0xff]   ;;  %v1505_v22 = vld [vmem:[#allocation4 + $0x60] ss:$16 sps:$4 sm:$0xff]   ;;  %v1506_v23 = vld [vmem:[#allocation4 + $0x84] ss:$16 sps:$4 sm:$0xff]  }
  0x2d   :  { %172 = vmatprep.subr.bf16.mxu1 %v1478_v6  ;;  %v1498_v24 = vld [vmem:[#allocation4 + $0x4c] ss:$16 sps:$4 sm:$0xff]   ;;  %v1511_v25 = vld [vmem:[#allocation4 + $0x80] ss:$16 sps:$4 sm:$0xff]   ;;  %v1496_v26 = vld [vmem:[#allocation4 + $0x48] ss:$16 sps:$4 sm:$0xff]  }
  0x2e   :  { %1014 = vmatpush1.bf16.msra.mxu0 %v1493_v14  ;;  %v1512_v27 = vld [vmem:[#allocation4 + $0xa4] ss:$16 sps:$4 sm:$0xff]   ;;  %v1504_v28 = vld [vmem:[#allocation4 + $0x6c] ss:$16 sps:$4 sm:$0xff]   ;;  %v1502_v29 = vld [vmem:[#allocation4 + $0x68] ss:$16 sps:$4 sm:$0xff]  }
  0x2f   :  { %1315 = vmatmul.mubr.msk.bf16.vlgmr.msra.gmra.mrb[0].mxu1 %vm127_vm0, %v56_v7  ;;  %1015 = vmatprep.subr.bf16.mxu0 %v1494_v15  ;;  %v1517_v30 = vld [vmem:[#allocation4 + $0xa0] ss:$16 sps:$4 sm:$0xff]   ;;  %v1518_v31 = vld [vmem:[#allocation4 + $0xc4] ss:$16 sps:$4 sm:$0xff]   ;;  %v1510_v32 = vld [vmem:[#allocation4 + $0x8c] ss:$16 sps:$4 sm:$0xff]  }
  0x30   :  { %173 = vmatpush1.bf16.msra.mxu1 %v1476_v9  ;;  %204 = vmatprep.mubr.bf16.mxu1 %v1726_v0  ;;  %v1523_v33 = vld [vmem:[#allocation4 + $0xc0] ss:$16 sps:$4 sm:$0xff]   ;;  %v1508_v34 = vld [vmem:[#allocation4 + $0x88] ss:$16 sps:$4 sm:$0xff]   ;;  %v1524_v35 = vld [vmem:[#allocation4 + $0xe4] ss:$16 sps:$4 sm:$0xff]  }
  0x31   :  { %174 = vmatprep.subr.bf16.mxu1 %v1481_v10  ;;  %v1516_v36 = vld [vmem:[#allocation4 + $0xac] ss:$16 sps:$4 sm:$0xff]   ;;  %v1514_v37 = vld [vmem:[#allocation4 + $0xa8] ss:$16 sps:$4 sm:$0xff]   ;;  %v1529_v38 = vld [vmem:[#allocation4 + $0xe0] ss:$16 sps:$4 sm:$0xff]  }
  0x32   :  { %1016 = vmatpush1.bf16.msra.mxu0 %v1499_v17  ;;  %v1530_v39 = vld [vmem:[#allocation4 + $0x104] ss:$16 sps:$4 sm:$0xff]   ;;  %v1522_v40 = vld [vmem:[#allocation4 + $0xcc] ss:$16 sps:$4 sm:$0xff]   ;;  %v1535_v41 = vld [vmem:[#allocation4 + $0x100] ss:$16 sps:$4 sm:$0xff]  }
  0x33   :  { %1017 = vmatprep.subr.bf16.mxu0 %v1500_v19  ;;  %v1520_v42 = vld [vmem:[#allocation4 + $0xc8] ss:$16 sps:$4 sm:$0xff]   ;;  %v1536_v43 = vld [vmem:[#allocation4 + $0x124] ss:$16 sps:$4 sm:$0xff]   ;;  %v1528_v44 = vld [vmem:[#allocation4 + $0xec] ss:$16 sps:$4 sm:$0xff]  }
  0x34   :  { %175 = vmatpush1.bf16.msra.mxu1 %v1479_v13  ;;  %v1526_v45 = vld [vmem:[#allocation4 + $0xe8] ss:$16 sps:$4 sm:$0xff]   ;;  %v1534_v46 = vld [vmem:[#allocation4 + $0x10c] ss:$16 sps:$4 sm:$0xff]   ;;  %v1541_v47 = vld [vmem:[#allocation4 + $0x120] ss:$16 sps:$4 sm:$0xff]   ;;  %v67_v13 = vlaneseq }
  0x35   :  { %1093 = vmatprep.subr.bf16.mxu1 %v1486_v16  ;;  %v1542_v48 = vld [vmem:[#allocation4 + $0x144] ss:$16 sps:$4 sm:$0xff]   ;;  %v1547_v49 = vld [vmem:[#allocation4 + $0x140] ss:$16 sps:$4 sm:$0xff]   ;;  %v1532_v50 = vld [vmem:[#allocation4 + $0x108] ss:$16 sps:$4 sm:$0xff]  }
  0x36   :  { %1018 = vmatpush1.bf16.msra.mxu0 %v1505_v22  ;;  %v1548_v51 = vld [vmem:[#allocation4 + $0x164] ss:$16 sps:$4 sm:$0xff]   ;;  %v1540_v52 = vld [vmem:[#allocation4 + $0x12c] ss:$16 sps:$4 sm:$0xff]   ;;  %v1553_v53 = vld [vmem:[#allocation4 + $0x160] ss:$16 sps:$4 sm:$0xff]  }
  0x37   :  { %1316 = vmatmul.mubr.msk.bf16.vlgmr.msra.gmra.mrb[4].mxu1 %vm127_vm0, %v56_v7  ;;  %1019 = vmatprep.subr.bf16.mxu0 %v1506_v23  ;;  %v1538_v54 = vld [vmem:[#allocation4 + $0x128] ss:$16 sps:$4 sm:$0xff]   ;;  %v1554_v55 = vld [vmem:[#allocation4 + $0x184] ss:$16 sps:$4 sm:$0xff]   ;;  %v1546_v56 = vld [vmem:[#allocation4 + $0x14c] ss:$16 sps:$4 sm:$0xff]  }
  0x38   :  { %1094 = vmatpush1.bf16.msra.mxu1 %v1484_v18  ;;  %v1559_v57 = vld [vmem:[#allocation4 + $0x180] ss:$16 sps:$4 sm:$0xff]   ;;  %v1544_v58 = vld [vmem:[#allocation4 + $0x148] ss:$16 sps:$4 sm:$0xff]   ;;  %v1560_v59 = vld [vmem:[#allocation4 + $0x1a4] ss:$16 sps:$4 sm:$0xff]  }
  0x39   :  { %1095 = vmatprep.subr.bf16.mxu1 %v1492_v20  ;;  %v1552_v60 = vld [vmem:[#allocation4 + $0x16c] ss:$16 sps:$4 sm:$0xff]   ;;  %v1565_v61 = vld [vmem:[#allocation4 + $0x1a0] ss:$16 sps:$4 sm:$0xff]   ;;  %v1550_v62 = vld [vmem:[#allocation4 + $0x168] ss:$16 sps:$4 sm:$0xff]  }
  0x3a   :  { %1020 = vmatpush1.bf16.msra.mxu0 %v1511_v25  ;;  %v1558_v63 = vld [vmem:[#allocation4 + $0x18c] ss:$16 sps:$4 sm:$0xff]   ;;  %v1556_v0 = vld [vmem:[#allocation4 + $0x188] ss:$16 sps:$4 sm:$0xff]   ;;  %v1566_v3 = vld [vmem:[#allocation4 + $0x1c4] ss:$16 sps:$4 sm:$0xff]  }
  0x3b   :  { %1021 = vmatprep.subr.bf16.mxu0 %v1512_v27  ;;  %v1564_v1 = vld [vmem:[#allocation4 + $0x1ac] ss:$16 sps:$4 sm:$0xff]   ;;  %v1562_v2 = vld [vmem:[#allocation4 + $0x1a8] ss:$16 sps:$4 sm:$0xff]   ;;  %v1571_v6 = vld [vmem:[#allocation4 + $0x1c0] ss:$16 sps:$4 sm:$0xff]  }
  0x3c   :  { %1096 = vmatpush1.bf16.msra.mxu1 %v1490_v21  ;;  %v1570_v4 = vld [vmem:[#allocation4 + $0x1cc] ss:$16 sps:$4 sm:$0xff]   ;;  %v1568_v5 = vld [vmem:[#allocation4 + $0x1c8] ss:$16 sps:$4 sm:$0xff]   ;;  %v1572_v7 = vld [vmem:[#allocation4 + $0x1e4] ss:$16 sps:$4 sm:$0xff]  }
  0x3d   :  { %1097 = vmatprep.subr.bf16.mxu1 %v1498_v24  ;;  %v1576_v8 = vld [vmem:[#allocation4 + $0x1ec] ss:$16 sps:$4 sm:$0xff]   ;;  %v1574_v9 = vld [vmem:[#allocation4 + $0x1e8] ss:$16 sps:$4 sm:$0xff]   ;;  %v1577_v10 = vld [vmem:[#allocation4 + $0x1e0] ss:$16 sps:$4 sm:$0xff]  }
  0x3e   :  { %1022 = vmatpush1.bf16.msra.mxu0 %v1517_v30  ;;  %v1580_v11 = vld [vmem:[#allocation4 + $0x204] ss:$16 sps:$4 sm:$0xff]   ;;  %v1583_v12 = vld [vmem:[#allocation4 + $0x20c] ss:$16 sps:$4 sm:$0xff]   ;;  %v1797_v14 = vshrl.u32 %v67_v13, 7 }
  0x3f   :  { %1023 = vmatprep.subr.bf16.mxu0 %v1518_v31  ;;  %v1803_v16 = vld [vmem:[%s1842_s2] sm:$0xf]  ;;  %v1581_v31 = vld [vmem:[#allocation4 + $0x208] ss:$16 sps:$4 sm:$0xff]   ;;  %v1640_v13 = vld [vmem:[#allocation4 + $0x344] ss:$16 sps:$4 sm:$0xff]  }
  0x40   :  { %1098 = vmatpush1.bf16.msra.mxu1 %v1496_v26  ;;  %v69_v15 = vsub.s32 0, %v1797_v14  ;;  %v73_v17 = vsub.s32 1, %v1797_v14  ;;  %v81_v25 = vsub.s32 3, %v1797_v14  ;;  %v1578_v30 = vld [vmem:[#allocation4 + $0x200] ss:$16 sps:$4 sm:$0xff]  }
  0x41   :  { %1099 = vmatprep.subr.bf16.mxu1 %v1504_v28 }
  0x42   :  { %1024 = vmatpush1.bf16.msra.mxu0 %v1523_v33  ;;  %v70_v18 = vrot.slane %v1803_v16, %v69_v15  ;;  %v74_v19 = vrot.slane %v1803_v16, %v73_v17 }
  0x43   :  { %1025 = vmatprep.subr.bf16.mxu0 %v1524_v35  ;;  %v1589_v35 = vld [vmem:[#allocation4 + $0x22c] ss:$16 sps:$4 sm:$0xff]  }
  0x44   :  { %1100 = vmatpush1.bf16.msra.mxu1 %v1502_v29 }
  0x45   :  { %1101 = vmatprep.subr.bf16.mxu1 %v1510_v32  ;;  %v82_v32 = vrot.slane %v1803_v16, %v81_v25 }
  0x46   :  { %1026 = vmatpush1.bf16.msra.mxu0 %v1529_v38  ;;  %v1584_v38 = vld [vmem:[#allocation4 + $0x220] ss:$16 sps:$4 sm:$0xff]  }
  0x47   :  { %1027 = vmatprep.subr.bf16.mxu0 %v1530_v39  ;;  %v1587_v39 = vld [vmem:[#allocation4 + $0x228] ss:$16 sps:$4 sm:$0xff]  }
  0x48   :  { %1102 = vmatpush1.bf16.msra.mxu1 %v1508_v34  ;;  %v1586_v34 = vld [vmem:[#allocation4 + $0x224] ss:$16 sps:$4 sm:$0xff]  }
  0x49   :  { %1103 = vmatprep.subr.bf16.mxu1 %v1516_v36 }
  0x4a   :  { %1028 = vmatpush1.bf16.msra.mxu0 %v1535_v41 }
  0x4b   :  { %1029 = vmatprep.subr.bf16.mxu0 %v1536_v43  ;;  %v1595_v43 = vld [vmem:[#allocation4 + $0x24c] ss:$16 sps:$4 sm:$0xff]  }
  0x4c   :  { %1104 = vmatpush1.bf16.msra.mxu1 %v1514_v37 }
  0x4d   :  { %1105 = vmatprep.subr.bf16.mxu1 %v1522_v40 }
  0x4e   :  { %1030 = vmatpush1.bf16.msra.mxu0 %v1541_v47  ;;  %v1593_v47 = vld [vmem:[#allocation4 + $0x248] ss:$16 sps:$4 sm:$0xff]  }
  0x4f   :  { %1031 = vmatprep.subr.bf16.mxu0 %v1542_v48 }
  0x50   :  { %1106 = vmatpush1.bf16.msra.mxu1 %v1520_v42  ;;  %v1592_v42 = vld [vmem:[#allocation4 + $0x244] ss:$16 sps:$4 sm:$0xff]  }
  0x51   :  { %1107 = vmatprep.subr.bf16.mxu1 %v1528_v44 }
  0x52   :  { %1032 = vmatpush1.bf16.msra.mxu0 %v1547_v49  ;;  %v1598_v49 = vld [vmem:[#allocation4 + $0x264] ss:$16 sps:$4 sm:$0xff]  }
  0x53   :  { %1033 = vmatprep.subr.bf16.mxu0 %v1548_v51  ;;  %v1596_v51 = vld [vmem:[#allocation4 + $0x260] ss:$16 sps:$4 sm:$0xff]  }
  0x54   :  { %1108 = vmatpush1.bf16.msra.mxu1 %v1526_v45 }
  0x55   :  { %1109 = vmatprep.subr.bf16.mxu1 %v1534_v46  ;;  %v1590_v46 = vld [vmem:[#allocation4 + $0x240] ss:$16 sps:$4 sm:$0xff]  }
  0x56   :  { %1034 = vmatpush1.bf16.msra.mxu0 %v1553_v53  ;;  %v1604_v53 = vld [vmem:[#allocation4 + $0x284] ss:$16 sps:$4 sm:$0xff]  }
  0x57   :  { %1035 = vmatprep.subr.bf16.mxu0 %v1554_v55  ;;  %v1602_v55 = vld [vmem:[#allocation4 + $0x280] ss:$16 sps:$4 sm:$0xff]  }
  0x58   :  { %1110 = vmatpush1.bf16.msra.mxu1 %v1532_v50  ;;  %v1601_v50 = vld [vmem:[#allocation4 + $0x26c] ss:$16 sps:$4 sm:$0xff]  }
  0x59   :  { %1111 = vmatprep.subr.bf16.mxu1 %v1540_v52  ;;  %v1599_v52 = vld [vmem:[#allocation4 + $0x268] ss:$16 sps:$4 sm:$0xff]  }
  0x5a   :  { %1036 = vmatpush1.bf16.msra.mxu0 %v1559_v57  ;;  %v1610_v57 = vld [vmem:[#allocation4 + $0x2a4] ss:$16 sps:$4 sm:$0xff]  }
  0x5b   :  { %1037 = vmatprep.subr.bf16.mxu0 %v1560_v59  ;;  %v1608_v59 = vld [vmem:[#allocation4 + $0x2a0] ss:$16 sps:$4 sm:$0xff]  }
  0x5c   :  { %1112 = vmatpush1.bf16.msra.mxu1 %v1538_v54  ;;  %v1607_v54 = vld [vmem:[#allocation4 + $0x28c] ss:$16 sps:$4 sm:$0xff]  }
  0x5d   :  { %1113 = vmatprep.subr.bf16.mxu1 %v1546_v56  ;;  %v1605_v56 = vld [vmem:[#allocation4 + $0x288] ss:$16 sps:$4 sm:$0xff]  }
  0x5e   :  { %1038 = vmatpush1.bf16.msra.mxu0 %v1565_v61  ;;  %v1616_v61 = vld [vmem:[#allocation4 + $0x2c4] ss:$16 sps:$4 sm:$0xff]  }
  0x5f   :  { %1039 = vmatprep.subr.bf16.mxu0 %v1566_v3  ;;  %v1620_v3 = vld [vmem:[#allocation4 + $0x2e0] ss:$16 sps:$4 sm:$0xff]  }
  0x60   :  { %1114 = vmatpush1.bf16.msra.mxu1 %v1544_v58  ;;  %v1613_v58 = vld [vmem:[#allocation4 + $0x2ac] ss:$16 sps:$4 sm:$0xff]  }
  0x61   :  { %1115 = vmatprep.subr.bf16.mxu1 %v1552_v60  ;;  %v1611_v60 = vld [vmem:[#allocation4 + $0x2a8] ss:$16 sps:$4 sm:$0xff]  }
  0x62   :  { %1040 = vmatpush1.bf16.msra.mxu0 %v1571_v6  ;;  %v1631_v6 = vld [vmem:[#allocation4 + $0x30c] ss:$16 sps:$4 sm:$0xff]  }
  0x63   :  { %1041 = vmatprep.subr.bf16.mxu0 %v1572_v7  ;;  %v1626_v7 = vld [vmem:[#allocation4 + $0x300] ss:$16 sps:$4 sm:$0xff]  }
  0x64   :  { %1116 = vmatpush1.bf16.msra.mxu1 %v1550_v62  ;;  %v1619_v62 = vld [vmem:[#allocation4 + $0x2cc] ss:$16 sps:$4 sm:$0xff]  }
  0x65   :  { %1117 = vmatprep.subr.bf16.mxu1 %v1558_v63  ;;  %v1614_v63 = vld [vmem:[#allocation4 + $0x2c0] ss:$16 sps:$4 sm:$0xff]  }
  0x66   :  { %1042 = vmatpush1.bf16.msra.mxu0 %v1577_v10  ;;  %v1637_v10 = vld [vmem:[#allocation4 + $0x32c] ss:$16 sps:$4 sm:$0xff]  }
  0x67   :  { %1052 = vmatprep.subr.bf16.mxu0 %v1580_v11  ;;  %v1632_v11 = vld [vmem:[#allocation4 + $0x320] ss:$16 sps:$4 sm:$0xff]  }
  0x68   :  { %1118 = vmatpush1.bf16.msra.mxu1 %v1556_v0  ;;  %v1617_v0 = vld [vmem:[#allocation4 + $0x2c8] ss:$16 sps:$4 sm:$0xff]  }
  0x69   :  { %1119 = vmatprep.subr.bf16.mxu1 %v1564_v1  ;;  %v1622_v1 = vld [vmem:[#allocation4 + $0x2e4] ss:$16 sps:$4 sm:$0xff]  }
  0x6c   :  { %1120 = vmatpush1.bf16.msra.mxu1 %v1562_v2  ;;  %v1625_v2 = vld [vmem:[#allocation4 + $0x2ec] ss:$16 sps:$4 sm:$0xff]  }
  0x6d   :  { %1121 = vmatprep.subr.bf16.mxu1 %v1570_v4  ;;  %v1623_v4 = vld [vmem:[#allocation4 + $0x2e8] ss:$16 sps:$4 sm:$0xff]  }
  0x70   :  { %1122 = vmatpush1.bf16.msra.mxu1 %v1568_v5  ;;  %v1628_v5 = vld [vmem:[#allocation4 + $0x304] ss:$16 sps:$4 sm:$0xff]  }
  0x71   :  { %1123 = vmatprep.subr.bf16.mxu1 %v1576_v8  ;;  %v1629_v8 = vld [vmem:[#allocation4 + $0x308] ss:$16 sps:$4 sm:$0xff]  }
  0x74   :  { %1124 = vmatpush1.bf16.msra.mxu1 %v1574_v9  ;;  %v1634_v9 = vld [vmem:[#allocation4 + $0x324] ss:$16 sps:$4 sm:$0xff]  }
  0x75   :  { %1134 = vmatprep.subr.bf16.mxu1 %v1583_v12  ;;  %v1635_v12 = vld [vmem:[#allocation4 + $0x328] ss:$16 sps:$4 sm:$0xff]  }
 0x102   :  { %v165_v20 = vpop.f32.mrb[0].mxu1 }
 0x103   :  { %v166_v21 = vadd.f32 %v165_v20, %v70_v18  ;;  %v167_v22 = vpop.f32.mrb[1].mxu1  ;;  %v1643_v18 = vld [vmem:[#allocation4 + $0x34c] ss:$16 sps:$4 sm:$0xff]   ;;  %v1641_v20 = vld [vmem:[#allocation4 + $0x348] ss:$16 sps:$4 sm:$0xff]  }
 0x104   :  { %v168_v23 = vadd.f32 %v167_v22, %v74_v19  ;;  %v169_v24 = vpop.f32.mrb[2].mxu1  ;;  %v1638_v19 = vld [vmem:[#allocation4 + $0x340] ss:$16 sps:$4 sm:$0xff]   ;;  %v1649_v22 = vld [vmem:[#allocation4 + $0x36c] ss:$16 sps:$4 sm:$0xff]  }
 0x105   :  { %v213_v26 = vmax.f32 %v166_v21, 0.0  ;;  %v170_v27 = vpop.f32.mrb[3].mxu1  ;;  %v1646_v21 = vld [vmem:[#allocation4 + $0x364] ss:$16 sps:$4 sm:$0xff]   ;;  %v1647_v24 = vld [vmem:[#allocation4 + $0x368] ss:$16 sps:$4 sm:$0xff]  }
 0x106   :  { %v214_v28 = vmax.f32 %v168_v23, 0.0  ;;  %v1644_v23 = vld [vmem:[#allocation4 + $0x360] ss:$16 sps:$4 sm:$0xff]   ;;  %v1655_v27 = vld [vmem:[#allocation4 + $0x38c] ss:$16 sps:$4 sm:$0xff]  }
 0x107   :  { %v217_v33 = vpack.c.bf16 %v213_v26, %v213_v26  ;;  %v1652_v26 = vld [vmem:[#allocation4 + $0x384] ss:$16 sps:$4 sm:$0xff]  }
 0x108   :  { %v218_v29 = vpack.c.bf16 %v214_v28, %v214_v28  ;;  %v1650_v28 = vld [vmem:[#allocation4 + $0x380] ss:$16 sps:$4 sm:$0xff]  }
 0x10a   :  { %1043 = vmatprep.mubr.bf16.mxu0 %v218_v29  ;;  %1125 = vmatprep.mubr.bf16.mxu1 %v218_v29  ;;  %v1816_v36 = vpop.f32.mrb[4].mxu1  ;;  %v1653_v29 = vld [vmem:[#allocation4 + $0x388] ss:$16 sps:$4 sm:$0xff]  }
 0x10b   :  { %1044 = vmatmul.mubr.bf16.vlgmr.msra.gmra.mrb[0].mxu0 %v217_v33  ;;  %1126 = vmatmul.mubr.bf16.vlgmr.msra.gmra.mrb[8].mxu1 %v217_v33  ;;  %v208_v37 = vpop.f32.mrb[5].mxu1  ;;  %v1656_v33 = vld [vmem:[#allocation4 + $0x3a0] ss:$16 sps:$4 sm:$0xff]  }
 0x10c   :  { %1053 = vmatpush1.bf16.msra.mxu0 %v1578_v30  ;;  %1135 = vmatpush1.bf16.msra.mxu1 %v1581_v31  ;;  %v209_v40 = vadd.f32 %v208_v37, %v82_v32  ;;  %v210_v41 = vpop.f32.mrb[6].mxu1  ;;  %v77_v30 = vsub.s32 2, %v1797_v14  ;;  %v1658_v31 = vld [vmem:[#allocation4 + $0x3a4] ss:$16 sps:$4 sm:$0xff]   ;;  %v1661_v32 = vld [vmem:[#allocation4 + $0x3ac] ss:$16 sps:$4 sm:$0xff]  }
 0x10d   :  { %1054 = vmatprep.subr.bf16.mxu0 %v1586_v34  ;;  %1136 = vmatprep.subr.bf16.mxu1 %v1589_v35  ;;  %v211_v44 = vpop.f32.mrb[7].mxu1  ;;  %v1659_v34 = vld [vmem:[#allocation4 + $0x3a8] ss:$16 sps:$4 sm:$0xff]   ;;  %v1664_v37 = vld [vmem:[#allocation4 + $0x3c4] ss:$16 sps:$4 sm:$0xff]  }
 0x10e   :  { %v216_v45 = vmax.f32 %v209_v40, 0.0  ;;  %v78_v35 = vrot.slane %v1803_v16, %v77_v30  ;;  %v1665_v40 = vld [vmem:[#allocation4 + $0x3c8] ss:$16 sps:$4 sm:$0xff]   ;;  %v1668_v44 = vld [vmem:[#allocation4 + $0x3e0] ss:$16 sps:$4 sm:$0xff]  }
 0x110   :  { %1055 = vmatpush1.bf16.msra.mxu0 %v1584_v38  ;;  %1137 = vmatpush1.bf16.msra.mxu1 %v1587_v39  ;;  %v220_v48 = vpack.c.bf16 %v216_v45, %v216_v45  ;;  %v1667_v38 = vld [vmem:[#allocation4 + $0x3cc] ss:$16 sps:$4 sm:$0xff]   ;;  %v1662_v39 = vld [vmem:[#allocation4 + $0x3c0] ss:$16 sps:$4 sm:$0xff]   ;;  %v207_v41 = vadd.f32 %v1816_v36, %v78_v35  ;;  %v1671_v45 = vld [vmem:[#allocation4 + $0x3e8] ss:$16 sps:$4 sm:$0xff]  }
 0x111   :  { %1056 = vmatprep.subr.bf16.mxu0 %v1592_v42  ;;  %1138 = vmatprep.subr.bf16.mxu1 %v1595_v43  ;;  %v1670_v42 = vld [vmem:[#allocation4 + $0x3e4] ss:$16 sps:$4 sm:$0xff]   ;;  %v1673_v43 = vld [vmem:[#allocation4 + $0x3ec] ss:$16 sps:$4 sm:$0xff]  }
 0x112   :  { %1084 = vmatprep.mubr.bf16.mxu0 %v220_v48  ;;  %1166 = vmatprep.mubr.bf16.mxu1 %v220_v48  ;;  %v1445_v36 = vld.sshfl [vmem:[%s1845_s5] sm:$0x33 pattern:$0x75316420] }
 0x114   :  { %1057 = vmatpush1.bf16.msra.mxu0 %v1590_v46  ;;  %1139 = vmatpush1.bf16.msra.mxu1 %v1593_v47  ;;  %v215_v46 = vmax.f32 %v207_v41, 0.0  ;;  %v1727_v47 = vmov 1966171168  }
 0x115   :  { %1058 = vmatprep.subr.bf16.mxu0 %v1598_v49  ;;  %1140 = vmatprep.subr.bf16.mxu1 %v1601_v50  ;;  %v1200_v48 = vunpack.c.l.s4 %v1727_v47  ;;  %v1198_v50 = vcombine.high %v1445_v36, %v1445_v36 }
 0x116   :  { %v219_v16 = vpack.c.bf16 %v215_v46, %v215_v46 }
 0x117   :  { %v1201_v49 = vunpack.c.0.s8 %v1200_v48 }
 0x118   :  { %1059 = vmatpush1.bf16.msra.mxu0 %v1596_v51  ;;  %1141 = vmatpush1.bf16.msra.mxu1 %v1599_v52 }
 0x119   :  { %1060 = vmatprep.subr.bf16.mxu0 %v1604_v53  ;;  %1142 = vmatprep.subr.bf16.mxu1 %v1607_v54  ;;  %v1204_v51 = vsub.s32 %v1201_v49, %v1797_v14  ;;  %v1184_v54 = vld [vmem:[%s1846_s6] sm:$0x3] }
 0x11a   :  { %1187 = vperm.xlu0 %1469, %v1184_v54  }
 0x11b   :  { %v1212_v52 = vrot.slane %v1198_v50, %v1204_v51  ;;  %v1205_v53 = vrot.slane %v1445_v36, %v1204_v51 }
 0x11c   :  { %1061 = vmatpush1.bf16.msra.mxu0 %v1602_v55  ;;  %1143 = vmatpush1.bf16.msra.mxu1 %v1605_v56  ;;  %v349_v55 = vld [vmem:[%s1844_s4] sm:$0xf] }
 0x11d   :  { %1062 = vmatprep.subr.bf16.mxu0 %v1610_v57  ;;  %1144 = vmatprep.subr.bf16.mxu1 %v1613_v58  ;;  %v354_v56 = vrot.slane %v349_v55, %v69_v15  ;;  %v358_v57 = vrot.slane %v349_v55, %v73_v17  ;;  %v366_v58 = vrot.slane %v349_v55, %v81_v25 }
 0x120   :  { %1063 = vmatpush1.bf16.msra.mxu0 %v1608_v59  ;;  %1145 = vmatpush1.bf16.msra.mxu1 %v1611_v60 }
 0x121   :  { %1064 = vmatprep.subr.bf16.mxu0 %v1616_v61  ;;  %1146 = vmatprep.subr.bf16.mxu1 %v1619_v62 }
 0x124   :  { %1065 = vmatpush1.bf16.msra.mxu0 %v1614_v63  ;;  %1147 = vmatpush1.bf16.msra.mxu1 %v1617_v0 }
 0x125   :  { %1066 = vmatprep.subr.bf16.mxu0 %v1622_v1  ;;  %1148 = vmatprep.subr.bf16.mxu1 %v1625_v2 }
 0x128   :  { %1067 = vmatpush1.bf16.msra.mxu0 %v1620_v3  ;;  %1149 = vmatpush1.bf16.msra.mxu1 %v1623_v4 }
 0x129   :  { %1068 = vmatprep.subr.bf16.mxu0 %v1628_v5  ;;  %1150 = vmatprep.subr.bf16.mxu1 %v1631_v6  ;;  %v362_v5 = vrot.slane %v349_v55, %v77_v30 }
 0x12c   :  { %1069 = vmatpush1.bf16.msra.mxu0 %v1626_v7  ;;  %1151 = vmatpush1.bf16.msra.mxu1 %v1629_v8 }
 0x12d   :  { %1070 = vmatprep.subr.bf16.mxu0 %v1634_v9  ;;  %1152 = vmatprep.subr.bf16.mxu1 %v1637_v10 }
 0x130   :  { %1071 = vmatpush1.bf16.msra.mxu0 %v1632_v11  ;;  %1153 = vmatpush1.bf16.msra.mxu1 %v1635_v12  ;;  %v1214_v11 = vcombine.high %v1212_v52, %v1212_v52 }
 0x131   :  { %1072 = vmatprep.subr.bf16.mxu0 %v1640_v13  ;;  %1154 = vmatprep.subr.bf16.mxu1 %v1643_v18  ;;  %v1213_v13 = vcombine.high %v1205_v53, %v1205_v53 }
 0x134   :  { %1073 = vmatpush1.bf16.msra.mxu0 %v1638_v19  ;;  %1155 = vmatpush1.bf16.msra.mxu1 %v1641_v20 }
 0x135   :  { %1074 = vmatprep.subr.bf16.mxu0 %v1646_v21  ;;  %1156 = vmatprep.subr.bf16.mxu1 %v1649_v22 }
 0x138   :  { %1075 = vmatpush1.bf16.msra.mxu0 %v1644_v23  ;;  %1157 = vmatpush1.bf16.msra.mxu1 %v1647_v24 }
 0x139   :  { %1076 = vmatprep.subr.bf16.mxu0 %v1652_v26  ;;  %1158 = vmatprep.subr.bf16.mxu1 %v1655_v27 }
 0x13c   :  { %1077 = vmatpush1.bf16.msra.mxu0 %v1650_v28  ;;  %1159 = vmatpush1.bf16.msra.mxu1 %v1653_v29 }
 0x13d   :  { %1078 = vmatprep.subr.bf16.mxu0 %v1658_v31  ;;  %1160 = vmatprep.subr.bf16.mxu1 %v1661_v32 }
 0x140   :  { %1079 = vmatpush1.bf16.msra.mxu0 %v1656_v33  ;;  %1161 = vmatpush1.bf16.msra.mxu1 %v1659_v34 }
 0x141   :  { %1080 = vmatprep.subr.bf16.mxu0 %v1664_v37  ;;  %1162 = vmatprep.subr.bf16.mxu1 %v1667_v38 }
 0x144   :  { %1081 = vmatpush1.bf16.msra.mxu0 %v1662_v39  ;;  %1163 = vmatpush1.bf16.msra.mxu1 %v1665_v40 }
 0x145   :  { %1082 = vmatprep.subr.bf16.mxu0 %v1670_v42  ;;  %1164 = vmatprep.subr.bf16.mxu1 %v1673_v43 }
 0x148   :  { %1083 = vmatpush1.bf16.msra.mxu0 %v1668_v44  ;;  %1165 = vmatpush1.bf16.msra.mxu1 %v1671_v45 }
 0x14b   :  { %1085 = vmatmul.mubr.bf16.vlgmr.msra.gmra.mrb[0].mxu0 %v219_v16  ;;  %1167 = vmatmul.mubr.bf16.vlgmr.msra.gmra.mrb[8].mxu1 %v219_v16 }
 0x14c   :  { %1251 = vmatprep.mubr.bf16.mxu0 %v1212_v52 }
 0x199   :  { %v1188_v18 = vpop.permute.xlu0 %1187 }
 0x21e   :  { %v1086_v59 = vpop.f32.mrb[0].mxu0  ;;  %v1168_v60 = vpop.f32.mrb[8].mxu1 }
 0x21f   :  { %v1446_v61 = vadd.f32 %v1086_v59, %v354_v56  ;;  %v1088_v62 = vpop.f32.mrb[1].mxu0  ;;  %v1170_v63 = vpop.f32.mrb[9].mxu1  ;;  %v1448_v10 = vadd.f32 %v1168_v60, %v362_v5 }
 0x220   :  { %v1447_v0 = vadd.f32 %v1088_v62, %v358_v57  ;;  %v1449_v1 = vadd.f32 %v1170_v63, %v366_v58  ;;  %v1090_v2 = vpop.f32.mrb[2].mxu0  ;;  %v1172_v3 = vpop.f32.mrb[10].mxu1 }
 0x221   :  { %v1175_v4 = vmax.f32 %v1446_v61, 0.0  ;;  %v1091_v6 = vpop.f32.mrb[3].mxu0  ;;  %v1173_v7 = vpop.f32.mrb[11].mxu1  ;;  %v1177_v25 = vmax.f32 %v1448_v10, 0.0 }
 0x222   :  { %v1176_v15 = vmax.f32 %v1447_v0, 0.0  ;;  %v1178_v8 = vmax.f32 %v1449_v1, 0.0 }
 0x223   :  { %v1179_v17 = vpack.c.bf16 %v1175_v4, %v1175_v4  ;;  %v1181_v12 = vpack.c.bf16 %v1177_v25, %v1177_v25 }
 0x224   :  { %v1180_v9 = vpack.c.bf16 %v1176_v15, %v1176_v15  ;;  %v1182_v14 = vpack.c.bf16 %v1178_v8, %v1178_v8 }
 0x226   :  { %1219 = vmatprep.subr.bf16.mxu0 %v1180_v9 }
 0x227   :  { %1220 = vmatpush1.bf16.xpose.msra.mxu0 %v1179_v17 }
 0x228   :  { %1259 = vmatprep.subr.bf16.mxu0 %v1182_v14 }
 0x22e   :  { %1252 = vmatmul.mubr.bf16.vlgmr.msra.gmra.mrb[4].mxu0 %v1205_v53 }
 0x22f   :  { %1260 = vmatpush1.bf16.xpose.msra.mxu0 %v1181_v12  ;;  %1291 = vmatprep.mubr.bf16.mxu0 %v1214_v11 }
 0x23a   :  { %1292 = vmatmul.mubr.bf16.vlgmr.msra.gmra.mrb[4].mxu0 %v1213_v13 }
 0x30d   :  { %v1293_v19 = vpop.f32.mrb[4].mxu0 }
 0x30e   :  { %v1450_v20 = vadd.f32 %v1293_v19, %v1188_v18  ;;  %v1295_v21 = vpop.f32.mrb[5].mxu0 }
 0x30f   :  { %v1296_v22 = vpop.f32.mrb[6].mxu0 }
 0x310   :  { %1300 = vst.msk [vmem:[%s1847_s7] sm:$0x3] %vm1299_vm1, %v1450_v20  ;;  %v1297_v23 = vpop.f32.mrb[7].mxu0 }
 0x311   :  { %1305 = vsyncpa [#allocation3], 1 }
 0x312   :  { %1306 = vsyncpa [#allocation5], 1 }

</bundles_post_ra>
